<compile_context>
chip_gen: v7x
topology: tpu7x:2x2x1
jax: 0.10.0
libtpu: 0.0.40
codegen_flags: <defaults>
</compile_context>

<pallas_src>
import jax
import jax.numpy as jnp
from jax.experimental import pallas as pl
from jax.experimental.pallas import tpu as pltpu


def _make_focal_ce_kernel(gamma: float, n_total: int, needs_mask: bool):
    """Kernel computing sum-of-focal-CE over row tiles; mean written at the end."""
    gamma = float(gamma)
    int_gamma = int(gamma) if float(int(gamma)) == gamma else None

    def kernel(logits_ref, target_ref, out_ref, acc_ref):
        step = pl.program_id(0)

        @pl.when(step == 0)
        def _init():
            acc_ref[...] = jnp.zeros_like(acc_ref)

        logits = logits_ref[...].astype(jnp.float32)      # (T, C)
        tgt = target_ref[...]                             # (T, 1) int32
        t, c = logits.shape

        # numerically stable softmax pieces
        m = jnp.max(logits, axis=-1, keepdims=True)                       # (T, 1)
        exp_shifted = jnp.exp(logits - m)                                 # (T, C)
        sum_exp = jnp.sum(exp_shifted, axis=-1, keepdims=True)            # (T, 1)

        # gather the target logit via a one-hot masked reduce
        # (no dynamic per-row gather on TPU VMEM refs)
        cols = jax.lax.broadcasted_iota(jnp.int32, (t, c), 1)             # (T, C)
        onehot = (cols == tgt).astype(jnp.float32)
        tgt_logit = jnp.sum(logits * onehot, axis=-1, keepdims=True)      # (T, 1)

        ce = (jnp.log(sum_exp) + m) - tgt_logit                           # per-sample CE

        if gamma == 0.0:
            # plain cross-entropy branch: no focal factor at all
            focal = ce
        else:
            # p = softmax(target) = exp(tgt_logit - m) / sum_exp, so
            # 1 - p = (sum_exp - exp(tgt_logit - m)) / sum_exp.
            # Only T extra exps (EUP slot) -- no second (T, C) reduce, and no
            # 1 - exp(-ce) cancellation for well-classified samples.
            tgt_exp = jnp.exp(tgt_logit - m)                               # (T, 1)
            one_minus_p = (sum_exp - tgt_exp) / sum_exp
            if int_gamma is not None and int_gamma >= 1:
                factor = one_minus_p
                for _ in range(int_gamma - 1):
                    factor = factor * one_minus_p
            else:
                factor = one_minus_p ** gamma
            focal = factor * ce

        if needs_mask:
            # zero out rows of the (padded) final tile that are past N
            rows = jax.lax.broadcasted_iota(jnp.int32, (t, 1), 0)
            valid = (step * t + rows) < n_total
            focal = jnp.where(valid, focal, 0.0)

        acc_ref[...] = acc_ref[...] + jnp.sum(focal, axis=0, keepdims=True)

        @pl.when(step == pl.num_programs(0) - 1)
        def _finalize():
            out_ref[...] = acc_ref[...] * (1.0 / n_total)

    return kernel


def _focal_ce_pallas(logits: jax.Array, target: jax.Array, gamma: float,
                     tile_n: int | None = None) -> jax.Array:
    """Mean focal cross-entropy loss over a (N, C) logits batch."""
    n, c = logits.shape
    target2d = target.astype(jnp.int32).reshape(n, 1)

    itemsize = jnp.dtype(logits.dtype).itemsize
    # sublane multiple for packed dtypes: 8 (f32) / 16 (bf16) / 32 (int8/fp8)
    sub = 8 * max(1, 4 // max(1, itemsize))

    if tile_n is None:
        # ~4 MiB per logits block: double-buffered pipeline fits the default
        # scoped-VMEM limit on v5e/v6e/v7x with room to spare.
        rows_for_budget = max(sub, (4 * 1024 * 1024) // max(1, c * itemsize))
        tile_n = min(1024, rows_for_budget)

    if tile_n >= n:
        tile_n = n                            # single tile: block == full array, always legal
    else:
        tile_n = max(sub, (tile_n // sub) * sub)   # keep the sublane dim aligned

    num_tiles = int(pl.cdiv(n, tile_n))
    needs_mask = (n % tile_n) != 0

    out = pl.pallas_call(
        _make_focal_ce_kernel(float(gamma), n, needs_mask),
        out_shape=jax.ShapeDtypeStruct((1, 1), jnp.float32),
        grid=(num_tiles,),
        in_specs=[
            pl.BlockSpec((tile_n, c), lambda i: (i, 0)),
            pl.BlockSpec((tile_n, 1), lambda i: (i, 0)),
        ],
        out_specs=pl.BlockSpec((1, 1), lambda i: (0, 0)),
        scratch_shapes=[pltpu.VMEM((1, 1), jnp.float32)],
        compiler_params=pltpu.CompilerParams(
            dimension_semantics=("arbitrary",),
            vmem_limit_bytes=32 * 1024 * 1024),
    )(logits, target2d)
    return out[0, 0]


class TwostageFocalLoss:
    """JAX/Pallas port of brl TwostageFocalLoss (weight=None supported)."""

    def __init__(self, weight=None, gamma=2):
        assert gamma >= 0
        # TODO(synk): per-class `weight` for the beta==1 branch not wired in
        # (module default weight=None, so semantics match the default config).
        assert weight is None, "class weights not supported in this synthetic kernel"
        self.gamma = gamma
        self.weight = weight
        self.epoch = -1
        self.step_epoch = 20
        self.betas = [0, 1]  # scheduler == 'drw'

    def forward(self, input, target, epoch, split):
        the_epoch = epoch["epoch"]
        idx = (the_epoch + 1) // self.step_epoch
        beta = self.betas[idx]
        if beta == 0:
            # plain mean cross-entropy == focal loss with gamma = 0
            return _focal_ce_pallas(input, target, gamma=0.0)
        if beta == 1:
            return _focal_ce_pallas(input, target, gamma=self.gamma)

    __call__ = forward


def _reference_loss(logits, target, gamma):
    """Pure-JAX reference for sanity checking (mirrors the PyTorch math)."""
    logits = logits.astype(jnp.float32)
    lse = jax.nn.logsumexp(logits, axis=-1)
    tgt_logit = jnp.take_along_axis(
        logits, target[:, None].astype(jnp.int32), axis=-1)[:, 0]
    ce = lse - tgt_logit
    p = jnp.exp(-ce)
    return jnp.mean(((1.0 - p) ** gamma) * ce)


if __name__ == "__main__":
    key = jax.random.PRNGKey(0)
    k1, k2, k3, k4, k5, k6 = jax.random.split(key, 6)

    # --- small shapes, single tile, both scheduler branches ---
    batch, num_classes = 8, 32
    logits = jax.random.normal(k1, (batch, num_classes), dtype=jnp.float32)
    target = jax.random.randint(k2, (batch,), 0, num_classes, dtype=jnp.int32)

    loss_mod = TwostageFocalLoss(weight=None, gamma=2)

    out_focal = loss_mod(logits, target, {"epoch": 25}, split="train")  # beta == 1
    out_ce = loss_mod(logits, target, {"epoch": 3}, split="train")      # beta == 0

    out_focal = jax.block_until_ready(out_focal)
    out_ce = jax.block_until_ready(out_ce)

    ref_focal = _reference_loss(logits, target, gamma=2.0)
    ref_ce = _reference_loss(logits, target, gamma=0.0)

    assert jnp.allclose(out_focal, ref_focal, rtol=1e-5, atol=1e-6), (out_focal, ref_focal)
    assert jnp.allclose(out_ce, ref_ce, rtol=1e-5, atol=1e-6), (out_ce, ref_ce)

    # --- still-small batch that exercises the tiled path + tail masking ---
    n2, c2 = 300, 128
    logits2 = jax.random.normal(k3, (n2, c2), dtype=jnp.float32)
    target2 = jax.random.randint(k4, (n2,), 0, c2, dtype=jnp.int32)

    out_tiled = _focal_ce_pallas(logits2, target2, gamma=2.0, tile_n=128)  # 3 tiles, last partial
    out_tiled = jax.block_until_ready(out_tiled)
    ref_tiled = _reference_loss(logits2, target2, gamma=2.0)
    assert jnp.allclose(out_tiled, ref_tiled, rtol=1e-5, atol=1e-6), (out_tiled, ref_tiled)

    # --- bf16 logits stay bf16 in HBM; cast to f32 only inside the kernel ---
    n3, c3 = 160, 64
    logits3 = jax.random.normal(k5, (n3, c3), dtype=jnp.bfloat16)
    target3 = jax.random.randint(k6, (n3,), 0, c3, dtype=jnp.int32)

    out_bf16 = _focal_ce_pallas(logits3, target3, gamma=2.0, tile_n=64)   # tiled, bf16 tiles
    out_bf16 = jax.block_until_ready(out_bf16)
    ref_bf16 = _reference_loss(logits3, target3, gamma=2.0)
    assert jnp.allclose(out_bf16, ref_bf16, rtol=1e-3, atol=1e-5), (out_bf16, ref_bf16)

    print("KERNEL_OK")
</pallas_src>

<mosaic_0001>
module attributes {stable_mosaic.version = 11 : i64} {
  func.func @kernel(%arg0: i32, %arg1: memref<8x32xf32, #tpu.memory_space<vmem>>, %arg2: memref<8x1xi32, #tpu.memory_space<vmem>>, %arg3: memref<1x1xf32, #tpu.memory_space<vmem>>, %arg4: memref<1x1xf32, #tpu.memory_space<vmem>>) attributes {dimension_semantics = [#tpu.dimension_semantics<arbitrary>], iteration_bounds = array<i64: 1>, scalar_prefetch = 0 : i64, scratch_operands = 1 : i64, tpu.core_type = #tpu.core_type<tc>, window_params = [{transform_indices = @transform_0, window_bounds = array<i64: 8, 32>}, {transform_indices = @transform_1, window_bounds = array<i64: 8, 1>}, {pipeline_mode = #tpu.pipeline_mode<synchronous>, transform_indices = @transform_2, window_bounds = array<i64: 1, 1>}]} {
    %c0_i32 = arith.constant 0 : i32
    %0 = arith.cmpi eq, %arg0, %c0_i32 : i32
    %1 = arith.extui %0 : i1 to i32
    %c0_i32_0 = arith.constant 0 : i32
    %2 = arith.cmpi ne, %1, %c0_i32_0 : i32
    scf.if %2 {
      %cst_13 = arith.constant 0.000000e+00 : f32
      %37 = vector.broadcast %cst_13 : f32 to vector<1x1xf32>
      %c0_14 = arith.constant 0 : index
      %c0_15 = arith.constant 0 : index
      %38 = vector.load %arg4[%c0_14, %c0_15] : memref<1x1xf32, #tpu.memory_space<vmem>>, vector<1x1xf32>
      tpu.vector_store %arg4[%c0_14, %c0_15], %37 {strides = array<i32>} : memref<1x1xf32, #tpu.memory_space<vmem>>, vector<1x1xf32>,
    } else {
    }
    %c0 = arith.constant 0 : index
    %c0_1 = arith.constant 0 : index
    %3 = vector.load %arg1[%c0, %c0_1] : memref<8x32xf32, #tpu.memory_space<vmem>>, vector<8x32xf32>
    %c0_2 = arith.constant 0 : index
    %c0_3 = arith.constant 0 : index
    %4 = vector.load %arg2[%c0_2, %c0_3] : memref<8x1xi32, #tpu.memory_space<vmem>>, vector<8x1xi32>
    %cst = arith.constant dense<0xFF800000> : vector<8xf32>
    %5 = vector.multi_reduction <maximumf>, %3, %cst [1] : vector<8x32xf32> to vector<8xf32>
    %6 = vector.shape_cast %5 : vector<8xf32> to vector<8x1xf32>
    %7 = vector.broadcast %6 : vector<8x1xf32> to vector<8x32xf32>
    %8 = arith.subf %3, %7 : vector<8x32xf32>
    %9 = math.exp %8 : vector<8x32xf32>
    %cst_4 = arith.constant dense<0.000000e+00> : vector<8xf32>
    %10 = vector.multi_reduction <add>, %9, %cst_4 [1] : vector<8x32xf32> to vector<8xf32>
    %11 = vector.shape_cast %10 : vector<8xf32> to vector<8x1xf32>
    %12 = tpu.iota {dimensions = array<i32: 1>} : vector<8x32xi32>
    %13 = vector.broadcast %4 : vector<8x1xi32> to vector<8x32xi32>
    %14 = arith.cmpi eq, %12, %13 : vector<8x32xi32>
    %15 = arith.extui %14 : vector<8x32xi1> to vector<8x32xi32>
    %16 = arith.sitofp %15 : vector<8x32xi32> to vector<8x32xf32>
    %17 = arith.mulf %3, %16 : vector<8x32xf32>
    %cst_5 = arith.constant dense<0.000000e+00> : vector<8xf32>
    %18 = vector.multi_reduction <add>, %17, %cst_5 [1] : vector<8x32xf32> to vector<8xf32>
    %19 = vector.shape_cast %18 : vector<8xf32> to vector<8x1xf32>
    %20 = math.log %11 : vector<8x1xf32>
    %21 = arith.addf %20, %6 : vector<8x1xf32>
    %22 = arith.subf %21, %19 : vector<8x1xf32>
    %23 = arith.subf %19, %6 : vector<8x1xf32>
    %24 = math.exp %23 : vector<8x1xf32>
    %25 = arith.subf %11, %24 : vector<8x1xf32>
    %26 = arith.divf %25, %11 : vector<8x1xf32>
    %27 = arith.mulf %26, %26 : vector<8x1xf32>
    %28 = arith.mulf %27, %22 : vector<8x1xf32>
    %c0_6 = arith.constant 0 : index
    %c0_7 = arith.constant 0 : index
    %29 = vector.load %arg4[%c0_6, %c0_7] : memref<1x1xf32, #tpu.memory_space<vmem>>, vector<1x1xf32>
    %cst_8 = arith.constant dense<0.000000e+00> : vector<1xf32>
    %30 = vector.multi_reduction <add>, %28, %cst_8 [0] : vector<8x1xf32> to vector<1xf32>
    %31 = vector.shape_cast %30 : vector<1xf32> to vector<1x1xf32>
    %32 = arith.addf %29, %31 : vector<1x1xf32>
    %c0_9 = arith.constant 0 : index
    %c0_10 = arith.constant 0 : index
    %33 = vector.load %arg4[%c0_9, %c0_10] : memref<1x1xf32, #tpu.memory_space<vmem>>, vector<1x1xf32>
    tpu.vector_store %arg4[%c0_9, %c0_10], %32 {strides = array<i32>} : memref<1x1xf32, #tpu.memory_space<vmem>>, vector<1x1xf32>,
    %c0_i32_11 = arith.constant 0 : i32
    %34 = arith.cmpi eq, %arg0, %c0_i32_11 : i32
    %35 = arith.extui %34 : i1 to i32
    %c0_i32_12 = arith.constant 0 : i32
    %36 = arith.cmpi ne, %35, %c0_i32_12 : i32
    scf.if %36 {
      %c0_13 = arith.constant 0 : index
      %c0_14 = arith.constant 0 : index
      %37 = vector.load %arg4[%c0_13, %c0_14] : memref<1x1xf32, #tpu.memory_space<vmem>>, vector<1x1xf32>
      %cst_15 = arith.constant 1.250000e-01 : f32
      %38 = vector.broadcast %cst_15 : f32 to vector<1x1xf32>
      %39 = arith.mulf %37, %38 : vector<1x1xf32>
      %c0_16 = arith.constant 0 : index
      %c0_17 = arith.constant 0 : index
      %40 = vector.load %arg3[%c0_16, %c0_17] : memref<1x1xf32, #tpu.memory_space<vmem>>, vector<1x1xf32>
      tpu.vector_store %arg3[%c0_16, %c0_17], %39 {strides = array<i32>} : memref<1x1xf32, #tpu.memory_space<vmem>>, vector<1x1xf32>,
    } else {
    }
    return
  }
  func.func @transform_0(%arg0: i32) -> (i32, i32) {
    %c0_i32 = arith.constant 0 : i32
    %c0_i32_0 = arith.constant 0 : i32
    return %arg0, %c0_i32 : i32, i32
  }
  func.func @transform_1(%arg0: i32) -> (i32, i32) {
    %c0_i32 = arith.constant 0 : i32
    %c0_i32_0 = arith.constant 0 : i32
    return %arg0, %c0_i32 : i32, i32
  }
  func.func @transform_2(%arg0: i32) -> (i32, i32) {
    %c0_i32 = arith.constant 0 : i32
    %c0_i32_0 = arith.constant 0 : i32
    %c0_i32_1 = arith.constant 0 : i32
    return %c0_i32, %c0_i32_0 : i32, i32
  }
}

</mosaic_0001>

<bundles_post_ra>
// kernel: tpu_custom_call.1
= control target key start
LH: loop header
LB: loop body
LE: loop exit
PB: predicated region body
PF: predicated region fallthrough
CT: control target
= control target key end

     0   :  { %vm20_vm0 = vcmask 261120   ;;  %s163_s0 = inlined_call_operand.vmem [shape: f32[8,32], index: 0, kind: input, shape index: {}]   ;;  %s164_s1 = inlined_call_operand.vmem [shape: s32[8,1], index: 1, kind: input, shape index: {}]   ;;  %s165_s2 = inlined_call_operand.hbm [shape: f32[1,1], index: 2, kind: output, shape index: {}]  }
   0x1   :  { %v18_v0 = vld [vmem:[%s163_s0] sm:$0xff] }
   0x2   :  { %7 = vsyncpa [#allocation4], 0  ;;  %v21_v1 = vsel %vm20_vm0, %v18_v0, -inf  ;;  %v121_v2 = vmov 0   ;;  %v19_v3 = vld [vmem:[%s164_s1] sm:$0xff]  ;;  %vm16_vm1 = vcmask 0   ;;  %v30_v7 = vlaneseq }
   0x3   :  { %88 = vset.pattern.permute.xlu0 %v121_v2  ;;  %v122_v4 = vmov 0.0   ;;  %s123_s0 = smov [#allocation3]  }
   0x4   :  { %22 = vmax.xlane.f32.xlu0 %v21_v1  ;;  %17 = vst.msk [vmem:[#allocation2] sm:$0x1] %vm16_vm1, %v122_v4  ;;  %v31_v9 = vand.u32 127, %v30_v7  ;;  %s76_s1 = sshll.u32 %s123_s0, 4  ;;  %s77_s1 = int_to_ptr.vmem [resolvable:$true] %s76_s1 }
   0x5   :  { %s97_s13 = scalar_lea.vmem %s77_s1, 16  ;;  %s101_s14 = scalar_lea.vmem %s77_s1, 32 }
   0x6   :  { %p98_p0 = scmp.ne.s32.totalorder %s77_s1, %s97_s13  ;;  %p102_p1 = scmp.lt.s32.totalorder %s77_s1, %s77_s1 }
   0x7   :  { %p103_p2 = scmp.lt.s32.totalorder %s101_s14, %s97_s13 }
   0x9   :  { %p104_p3 = por %p103_p2, %p102_p1 }
   0xb   :  { %v54_v35 = vld [vmem:[#allocation2] sm:$0x1]  ;;  %p105_p4 = pnand %p104_p3, %p98_p0 }
  0x1a   :  { %33 = vperm.xlu0 %88, %v19_v3  }
  0x91   :  { %v23_v5 = vpop.xlane.xlu0 %22 }
  0x92   :  { %v24_v6 = vsub.f32 %v18_v0, %v23_v5 }
  0x94   :  { %v25_v8 = vmul.f32 1.442695, %v24_v6 }
  0x96   :  { %89 = vpow2.f32 %v25_v8 }
  0x99   :  { %v34_v10 = vpop.permute.xlu0 %33 }
  0x9a   :  { %vm35_vm2 = vcmp.eq.s32.totalorder %v31_v9, %v34_v10 }
  0x9b   :  { %v84_v11 = vsel %vm35_vm2, 1.0, %v122_v4 }
  0x9c   :  { %v38_v12 = vmul.f32 %v84_v11, %v18_v0 }
  0x9e   :  { %v39_v13 = vsel %vm20_vm0, %v38_v12, 0.0 }
  0x9f   :  { %40 = vadd.xlane.f32.xlu1 %v39_v13 }
  0xa0   :  { %v90_v14 = vpop.eup %89 }
  0xa1   :  { %v27_v15 = vsel %vm20_vm0, %v90_v14, 0.0 }
  0xa3   :  { %28 = vadd.xlane.f32.xlu1 %v27_v15 }
 0x12c   :  { %v41_v16 = vpop.xlane.xlu1 %40 }
 0x12d   :  { %v46_v17 = vsub.f32 %v41_v16, %v23_v5 }
 0x12f   :  { %v47_v18 = vmul.f32 1.442695, %v46_v17 }
 0x130   :  { %v29_v19 = vpop.xlane.xlu1 %28 }
 0x131   :  { %91 = vpow2.f32 %v47_v18 }
 0x132   :  { %93 = vlog2.f32 %v29_v19 }
 0x133   :  { %95 = vrcp.f32 %v29_v19 }
 0x13b   :  { %v92_v20 = vpop.eup %91 }
 0x13c   :  { %v94_v21 = vpop.eup %93  ;;  %v49_v22 = vsub.f32 %v29_v19, %v92_v20 }
 0x13d   :  { %v96_v23 = vpop.eup %95  ;;  %v43_v24 = vmul.f32 0.6931472, %v94_v21 }
 0x13e   :  { %v51_v25 = vmul.f32 %v96_v23, %v49_v22 }
 0x13f   :  { %v44_v26 = vadd.f32 %v43_v24, %v23_v5 }
 0x140   :  { %v52_v27 = vmul.f32 %v51_v25, %v51_v25 }
 0x141   :  { %v45_v28 = vsub.f32 %v44_v26, %v41_v16 }
 0x143   :  { %v53_v29 = vmul.f32 %v52_v27, %v45_v28 }
 0x145   :  { %v55_v30 = vrot.slane %v53_v29, 4 }
 0x147   :  { %v56_v31 = vadd.f32 %v55_v30, %v53_v29 }
 0x149   :  { %v57_v32 = vrot.slane %v56_v31, 2 }
 0x14b   :  { %v58_v33 = vadd.f32 %v57_v32, %v56_v31 }
 0x14d   :  { %v59_v34 = vrot.slane %v58_v33, 1 }
 0x14f   :  { %v60_v36 = vadd.f32 %v59_v34, %v58_v33 }
 0x151   :  { %v61_v37 = vadd.f32 %v60_v36, %v54_v35 }
 0x153   :  { %63 = vst.msk [vmem:[#allocation2] sm:$0x1] %vm16_vm1, %v61_v37 }
 0x15a   :  { %v67_v38 = vld [vmem:[#allocation2] sm:$0x1] }
 0x15b   :  { %v68_v39 = vmul.f32 0.125, %v67_v38 }
 0x15d   :  { %69 = vst.msk [vmem:[#allocation3] sm:$0x1] %vm16_vm1, %v68_v39 }
 0x15e   :  { %108 = shalt.err (!%p105_p4)
}
 0x15f   :  { %s109_s17 = scalar_lea.hbm %s165_s2, 16 }
 0x160   :  { %p110_p5 = scmp.ne.s32.totalorder %s165_s2, %s109_s17  ;;  %p113_p6 = scmp.lt.u32.totalorder %s109_s17, %s165_s2 }
 0x162   :  { %p115_p7 = pnand %p113_p6, %p110_p5 }
 0x164   :  { %118 = shalt.err (!%p115_p7)
}
 0x165   :  { %79 = dma.vmem_to_hbm [thread:$0]  %s77_s1, 16, %s165_s2, [#allocation4]  }
 0x166   :  { %119 = dma.done.wait [#allocation4], 16  }
 0x167   :  { %120 = vsyncadd [#allocation4], 4294967280 }
 0x168   :  { %83 = vsyncpa [#allocation4], 1 }

</bundles_post_ra>
